<compile_context>
chip_gen: v7x
topology: tpu7x:2x2x1
jax: 0.10.0
libtpu: 0.0.40
codegen_flags: <defaults>
</compile_context>

<pallas_src>
import math

import jax
import jax.numpy as jnp
from jax.experimental import pallas as pl
from jax.experimental.pallas import tpu as pltpu


def _round_up(n, m):
    return -(-n // m) * m


def _mlp_kernel(x_ref, w1_ref, w2_ref, w3_ref, b_ref, o_ref):
    """Fused 3-layer MLP on one batch block (whole problem fits in VMEM)."""
    h1p = w1_ref.shape[1]   # 512
    h2p = w2_ref.shape[1]   # 384
    ap = w3_ref.shape[1]    # 8

    bias = b_ref[...]       # (8, 512) f32: rows 0/1/2 hold b1/b2/b3 (zero-padded)

    # fc1 + ReLU  — bf16 MXU operands, f32 accumulation, f32 elementwise.
    h = jnp.dot(x_ref[...].astype(jnp.bfloat16), w1_ref[...],
                preferred_element_type=jnp.float32)
    h = jnp.maximum(h + bias[0:1, :h1p], 0.0)

    # fc2 + ReLU
    h = jnp.dot(h.astype(jnp.bfloat16), w2_ref[...],
                preferred_element_type=jnp.float32)
    h = jnp.maximum(h + bias[1:2, :h2p], 0.0)

    # fc3 (no activation) — tiny (Bblk, 8) store.
    out = jnp.dot(h.astype(jnp.bfloat16), w3_ref[...],
                  preferred_element_type=jnp.float32)
    o_ref[...] = (out + bias[2:3, :ap]).astype(o_ref.dtype)


def _cost_estimate(bp, sd, h1p, h2p, ap):
    flops = 2 * bp * (sd * h1p + h1p * h2p + h2p * ap)
    bytes_accessed = (bp * sd * 4            # x (f32)
                      + sd * h1p * 2         # w1 (bf16)
                      + h1p * h2p * 2        # w2 (bf16)
                      + h2p * ap * 2         # w3 (bf16)
                      + 8 * h1p * 4          # bias slab (f32)
                      + bp * ap * 4)         # out (f32)
    return pl.CostEstimate(flops=flops, transcendentals=0,
                           bytes_accessed=bytes_accessed)


def net_forward(x, params, action_dim=4, *, batch_tile=256):
    """x: (B, state_dim) float32. Returns (B, action_dim) float32."""
    w1, w2, w3, bias = params["w1"], params["w2"], params["w3"], params["bias"]
    sd, h1p = w1.shape
    h2p, ap = w3.shape
    B = x.shape[0]

    if B <= batch_tile:
        # Small batch (online action selection): one gridless call.
        Bp = _round_up(max(B, 1), 8)
        if Bp != B:
            x = jnp.pad(x, ((0, Bp - B), (0, 0)))
        vmem = pl.BlockSpec(memory_space=pltpu.MemorySpace.VMEM)
        out = pl.pallas_call(
            _mlp_kernel,
            out_shape=jax.ShapeDtypeStruct((Bp, ap), jnp.float32),
            in_specs=[vmem] * 5,
            out_specs=vmem,
            cost_estimate=_cost_estimate(Bp, sd, h1p, h2p, ap),
        )(x, w1, w2, w3, bias)
    else:
        # Replay-batch scale: tile the batch on a parallel grid axis; weights
        # use a constant index_map so they are fetched into VMEM once and
        # reused for every batch block (and both TCs on v7x split the blocks).
        Bp = _round_up(B, batch_tile)
        if Bp != B:
            x = jnp.pad(x, ((0, Bp - B), (0, 0)))
        nb = Bp // batch_tile
        out = pl.pallas_call(
            _mlp_kernel,
            out_shape=jax.ShapeDtypeStruct((Bp, ap), jnp.float32),
            grid=(nb,),
            in_specs=[
                pl.BlockSpec((batch_tile, sd), lambda i: (i, 0)),
                pl.BlockSpec((sd, h1p), lambda i: (0, 0)),
                pl.BlockSpec((h1p, h2p), lambda i: (0, 0)),
                pl.BlockSpec((h2p, ap), lambda i: (0, 0)),
                pl.BlockSpec(bias.shape, lambda i: (0, 0)),
            ],
            out_specs=pl.BlockSpec((batch_tile, ap), lambda i: (i, 0)),
            compiler_params=pltpu.CompilerParams(
                dimension_semantics=("parallel",)),
            cost_estimate=_cost_estimate(Bp, sd, h1p, h2p, ap),
        )(x, w1, w2, w3, bias)

    return out[:B, :action_dim]


def init_params(key, state_dim=8, action_dim=4, hidden_dim=(400, 300)):
    """PyTorch-style init U(-1/sqrt(fan_in), 1/sqrt(fan_in)), then pad + bf16-cast."""
    h1, h2 = hidden_dim
    h1p = _round_up(h1, 128)               # 400 -> 512
    h2p = _round_up(h2, 128)               # 300 -> 384
    ap = _round_up(action_dim, 8)          # 4   -> 8   (no 128-lane zero padding)
    bw = max(h1p, h2p, ap)                 # combined-bias lane width (512)
    keys = jax.random.split(key, 6)

    def linear(kw, kb, fan_in, fan_out):
        bound = 1.0 / math.sqrt(fan_in)
        # Stored in (in, out) layout == PyTorch weight (out, in) transposed.
        w = jax.random.uniform(kw, (fan_in, fan_out), jnp.float32, -bound, bound)
        b = jax.random.uniform(kb, (fan_out,), jnp.float32, -bound, bound)
        return w, b

    w1, b1 = linear(keys[0], keys[1], state_dim, h1)
    w2, b2 = linear(keys[2], keys[3], h1, h2)
    w3, b3 = linear(keys[4], keys[5], h2, action_dim)

    def pad_to(a, shape):
        return jnp.pad(a, [(0, t - s) for s, t in zip(a.shape, shape)])

    # Zero-padded, bf16 weights (padding contributes exactly zero to the math).
    w1p = pad_to(w1, (state_dim, h1p)).astype(jnp.bfloat16)
    w2p = pad_to(w2, (h1p, h2p)).astype(jnp.bfloat16)
    w3p = pad_to(w3, (h2p, ap)).astype(jnp.bfloat16)

    # One combined f32 bias slab: row 0 = b1, row 1 = b2, row 2 = b3 (zero-padded).
    bias = jnp.zeros((8, bw), jnp.float32)
    bias = bias.at[0, :h1].set(b1)
    bias = bias.at[1, :h2].set(b2)
    bias = bias.at[2, :action_dim].set(b3)

    return {"w1": w1p, "w2": w2p, "w3": w3p, "bias": bias}


def _reference(x, params, action_dim=4):
    """Pure-JAX reference mirroring the kernel's bf16-operand / f32-accumulate math."""
    w1, w2, w3, bias = params["w1"], params["w2"], params["w3"], params["bias"]
    h1p, h2p, ap = w1.shape[1], w2.shape[1], w3.shape[1]

    def dense(h, w, b):
        return jnp.dot(h.astype(jnp.bfloat16), w,
                       preferred_element_type=jnp.float32) + b

    h = jnp.maximum(dense(x, w1, bias[0:1, :h1p]), 0.0)
    h = jnp.maximum(dense(h, w2, bias[1:2, :h2p]), 0.0)
    out = dense(h, w3, bias[2:3, :ap])
    return out[:, :action_dim]


if __name__ == "__main__":
    key = jax.random.PRNGKey(0)
    k_params, k_x1, k_x2 = jax.random.split(key, 3)

    state_dim, action_dim = 8, 4
    params = init_params(k_params, state_dim=state_dim, action_dim=action_dim,
                         hidden_dim=(400, 300))

    # 1) Small batch (B=2): single gridless call (online action selection).
    x_small = jax.random.normal(k_x1, (2, state_dim), dtype=jnp.float32)
    out_small = jax.block_until_ready(net_forward(x_small, params, action_dim))
    ref_small = _reference(x_small, params, action_dim)
    assert out_small.shape == (2, action_dim), out_small.shape
    assert jnp.allclose(out_small, ref_small, atol=1e-3, rtol=1e-3), \
        "small-batch mismatch vs reference"

    # 2) Replay-batch scale (B=300): exercises the batch-grid / parallel path
    #    with VMEM-resident weights across blocks.
    x_big = jax.random.normal(k_x2, (300, state_dim), dtype=jnp.float32)
    out_big = jax.block_until_ready(net_forward(x_big, params, action_dim))
    ref_big = _reference(x_big, params, action_dim)
    assert out_big.shape == (300, action_dim), out_big.shape
    assert jnp.allclose(out_big, ref_big, atol=1e-3, rtol=1e-3), \
        "batched mismatch vs reference"

    print("KERNEL_OK")
</pallas_src>

<mosaic_0001>
module attributes {stable_mosaic.version = 11 : i64} {
  func.func @_mlp_kernel(%arg0: memref<8x8xf32, #tpu.memory_space<vmem>>, %arg1: memref<8x512xbf16, #tpu.memory_space<vmem>>, %arg2: memref<512x384xbf16, #tpu.memory_space<vmem>>, %arg3: memref<384x8xbf16, #tpu.memory_space<vmem>>, %arg4: memref<8x512xf32, #tpu.memory_space<vmem>>, %arg5: memref<8x8xf32, #tpu.memory_space<vmem>>) attributes {dimension_semantics = [], scalar_prefetch = 0 : i64, scratch_operands = 0 : i64, tpu.core_type = #tpu.core_type<tc>} {
    %c0 = arith.constant 0 : index
    %c0_0 = arith.constant 0 : index
    %0 = vector.load %arg4[%c0, %c0_0] : memref<8x512xf32, #tpu.memory_space<vmem>>, vector<8x512xf32>
    %c0_1 = arith.constant 0 : index
    %c0_2 = arith.constant 0 : index
    %1 = vector.load %arg0[%c0_1, %c0_2] : memref<8x8xf32, #tpu.memory_space<vmem>>, vector<8x8xf32>
    %2 = arith.truncf %1 : vector<8x8xf32> to vector<8x8xbf16>
    %c0_3 = arith.constant 0 : index
    %c0_4 = arith.constant 0 : index
    %3 = vector.load %arg1[%c0_3, %c0_4] : memref<8x512xbf16, #tpu.memory_space<vmem>>, vector<8x512xbf16>
    %cst = arith.constant dense<0.000000e+00> : vector<8x512xf32>
    %4 = tpu.matmul %2, %3, %cst {dimension_numbers = #tpu.dot_dimension_numbers<[1], [0], [0], [1], [0, 0, 1, 1], [], []>} : vector<8x8xbf16>, vector<8x512xbf16>, vector<8x512xf32> -> vector<8x512xf32>
    %5 = vector.extract_strided_slice %0 {offsets = [0, 0], sizes = [1, 512], strides = [1, 1]} : vector<8x512xf32> to vector<1x512xf32>
    %6 = vector.broadcast %5 : vector<1x512xf32> to vector<8x512xf32>
    %7 = arith.addf %4, %6 : vector<8x512xf32>
    %cst_5 = arith.constant 0.000000e+00 : f32
    %8 = vector.broadcast %cst_5 : f32 to vector<8x512xf32>
    %9 = arith.maximumf %7, %8 : vector<8x512xf32>
    %10 = arith.truncf %9 : vector<8x512xf32> to vector<8x512xbf16>
    %c0_6 = arith.constant 0 : index
    %c0_7 = arith.constant 0 : index
    %11 = vector.load %arg2[%c0_6, %c0_7] : memref<512x384xbf16, #tpu.memory_space<vmem>>, vector<512x384xbf16>
    %cst_8 = arith.constant dense<0.000000e+00> : vector<8x384xf32>
    %12 = tpu.matmul %10, %11, %cst_8 {dimension_numbers = #tpu.dot_dimension_numbers<[1], [0], [0], [1], [0, 0, 1, 1], [], []>} : vector<8x512xbf16>, vector<512x384xbf16>, vector<8x384xf32> -> vector<8x384xf32>
    %13 = vector.extract_strided_slice %0 {offsets = [1, 0], sizes = [1, 384], strides = [1, 1]} : vector<8x512xf32> to vector<1x384xf32>
    %14 = vector.broadcast %13 : vector<1x384xf32> to vector<8x384xf32>
    %15 = arith.addf %12, %14 : vector<8x384xf32>
    %cst_9 = arith.constant 0.000000e+00 : f32
    %16 = vector.broadcast %cst_9 : f32 to vector<8x384xf32>
    %17 = arith.maximumf %15, %16 : vector<8x384xf32>
    %18 = arith.truncf %17 : vector<8x384xf32> to vector<8x384xbf16>
    %c0_10 = arith.constant 0 : index
    %c0_11 = arith.constant 0 : index
    %19 = vector.load %arg3[%c0_10, %c0_11] : memref<384x8xbf16, #tpu.memory_space<vmem>>, vector<384x8xbf16>
    %cst_12 = arith.constant dense<0.000000e+00> : vector<8x8xf32>
    %20 = tpu.matmul %18, %19, %cst_12 {dimension_numbers = #tpu.dot_dimension_numbers<[1], [0], [0], [1], [0, 0, 1, 1], [], []>} : vector<8x384xbf16>, vector<384x8xbf16>, vector<8x8xf32> -> vector<8x8xf32>
    %21 = vector.extract_strided_slice %0 {offsets = [2, 0], sizes = [1, 8], strides = [1, 1]} : vector<8x512xf32> to vector<1x8xf32>
    %22 = vector.broadcast %21 : vector<1x8xf32> to vector<8x8xf32>
    %23 = arith.addf %20, %22 : vector<8x8xf32>
    %c0_13 = arith.constant 0 : index
    %c0_14 = arith.constant 0 : index
    %24 = vector.load %arg5[%c0_13, %c0_14] : memref<8x8xf32, #tpu.memory_space<vmem>>, vector<8x8xf32>
    tpu.vector_store %arg5[%c0_13, %c0_14], %23 {strides = array<i32>} : memref<8x8xf32, #tpu.memory_space<vmem>>, vector<8x8xf32>,
    return
  }
}

</mosaic_0001>

<bundles_post_ra>
// kernel: tpu_custom_call.1
= control target key start
LH: loop header
LB: loop body
LE: loop exit
PB: predicated region body
PF: predicated region fallthrough
CT: control target
= control target key end

     0   :  { %10 = vsyncpa [#allocation3], 0  ;;  %s1913_s0 = inlined_call_operand.vmem [shape: f32[8,8], index: 0, kind: input, shape index: {}]   ;;  %s1914_s1 = inlined_call_operand.vmem [shape: bf16[8,512], index: 1, kind: input, shape index: {}]   ;;  %s1915_s2 = inlined_call_operand.hbm [shape: bf16[512,384], index: 2, kind: input, shape index: {}]   ;;  %s1916_s3 = inlined_call_operand.vmem [shape: bf16[384,8], index: 3, kind: input, shape index: {}]   ;;  %s1917_s4 = inlined_call_operand.vmem [shape: f32[8,512], index: 4, kind: input, shape index: {}]   ;;  %s1918_s5 = inlined_call_operand.hbm [shape: f32[8,8], index: 5, kind: output, shape index: {}]  }
   0x1   :  { %11 = vsyncpa [#allocation4], 0  ;;  %s1729_s18 = smov [#allocation2]   ;;  %s1681_s22 = scalar_lea.hbm %s1915_s2, 12288 }
   0x2   :  { %s21_s19 = sshll.u32 %s1729_s18, 4  ;;  %p1682_p0 = scmp.ne.s32.totalorder %s1915_s2, %s1681_s22  ;;  %s22_s19 = int_to_ptr.vmem [resolvable:$true] %s21_s19 }
   0x3   :  { %p1685_p1 = scmp.lt.u32.totalorder %s1681_s22, %s1915_s2 }
   0x5   :  { %p1687_p2 = pnand %p1685_p1, %p1682_p0 }
   0x7   :  { %1690 = shalt.err (!%p1687_p2)
}
   0x8   :  { %s1691_s27 = scalar_lea.vmem %s22_s19, 12288  ;;  %p1696_p4 = scmp.lt.s32.totalorder %s22_s19, %s22_s19 }
   0x9   :  { %p1692_p3 = scmp.ne.s32.totalorder %s22_s19, %s1691_s27  ;;  %p1697_p5 = scmp.lt.s32.totalorder %s1691_s27, %s1691_s27 }
   0xb   :  { %p1698_p6 = por %p1697_p5, %p1696_p4 }
   0xd   :  { %p1699_p7 = pnand %p1698_p6, %p1692_p3 }
   0xf   :  { %1702 = shalt.err (!%p1699_p7)
}
  0x10   :  { %s1730_s28 = smov 192   ;;  %s1731_s29 = smov 12  }
  0x11   :  { %27 = dma.hbm_to_vmem [thread:$0]  %s1915_s2, 12288, %s22_s19, [#allocation3], %s1730_s28, %s1730_s28, %s1731_s29  }
  0x12   :  { %1725 = dma.done.wait [#allocation3], 12288  }
  0x13   :  { %1726 = vsyncadd [#allocation3], 4294955008  ;;  %v1732_v0 = vmov 0   ;;  %v42_v1 = vld [vmem:[%s1914_s1] sm:$0xff]  ;;  %vm74_vm0 = vcmask 1043456   ;;  %v43_v3 = vld [vmem:[%s1914_s1 + $0x8] sm:$0xff]  ;;  %v44_v61 = vlaneseq }
  0x14   :  { %119 = vmatprep.mubr.bf16.mxu0 %v1732_v0  ;;  %160 = vmatprep.mubr.bf16.mxu1 %v1732_v0  ;;  %v40_v2 = vld [vmem:[%s1913_s0] sm:$0xff]  ;;  %v1290_v4 = vcombine.high %v42_v1, %v42_v1  ;;  %v1289_v5 = vcombine.low %v42_v1, %v42_v1  ;;  %v1292_v6 = vcombine.high %v43_v3, %v43_v3  ;;  %vm70_vm1 = vcmask 64512   ;;  %v1534_v13 = vld [vmem:[#allocation2 + $0x1c] ss:$12 sps:$4 sm:$0xff]   ;;  %v1540_v17 = vld [vmem:[#allocation2 + $0x4c] ss:$12 sps:$4 sm:$0xff]  }
  0x15   :  { %v1291_v7 = vcombine.low %v43_v3, %v43_v3  ;;  %v1531_v8 = vld [vmem:[#allocation2 + $0x4] ss:$12 sps:$4 sm:$0xff]   ;;  %v41_v10 = vpack.c.bf16 %v40_v2, %v40_v2  ;;  %v1529_v12 = vld [vmem:[#allocation2] ss:$12 sps:$4 sm:$0xff]   ;;  %v1556_v18 = vld [vmem:[#allocation2 + $0xc8] ss:$12 sps:$4 sm:$0xff]  }
  0x16   :  { %1293 = vmatprep.subr.msk.bf16.mxu0 %vm74_vm0, %v1290_v4  ;;  %v76_v9 = vsel %vm74_vm0, %v1289_v5, 0  ;;  %1295 = vmatprep.subr.msk.bf16.mxu1 %vm74_vm0, %v1292_v6  ;;  %v1532_v14 = vld [vmem:[#allocation2 + $0x18] ss:$12 sps:$4 sm:$0xff]   ;;  %v1537_v15 = vld [vmem:[#allocation2 + $0x34] ss:$12 sps:$4 sm:$0xff]   ;;  %v1789_v62 = vshrl.u32 %v44_v61, 7 }
  0x17   :  { %88 = vmatpush1.bf16.msra.mxu0 %v76_v9  ;;  %v82_v11 = vsel %vm74_vm0, %v1291_v7, 0  ;;  %v1535_v16 = vld [vmem:[#allocation2 + $0x30] ss:$12 sps:$4 sm:$0xff]   ;;  %v1557_v19 = vld [vmem:[#allocation2 + $0x8] ss:$12 sps:$4 sm:$0xff]   ;;  %v1797_v0 = vld [vmem:[%s1917_s4] sm:$0xff] }
  0x18   :  { %129 = vmatpush1.bf16.msra.mxu1 %v82_v11  ;;  %829 = vmatprep.subr.bf16.mxu0 %v1531_v8  ;;  %v1538_v20 = vld [vmem:[#allocation2 + $0x48] ss:$12 sps:$4 sm:$0xff]   ;;  %v1543_v21 = vld [vmem:[#allocation2 + $0x64] ss:$12 sps:$4 sm:$0xff]   ;;  %v1561_v22 = vld [vmem:[#allocation2 + $0xe0] ss:$12 sps:$4 sm:$0xff]  }
  0x19   :  { %1417 = vmatprep.subr.bf16.mxu1 %v1556_v18  ;;  %v1562_v23 = vld [vmem:[#allocation2 + $0x20] ss:$12 sps:$4 sm:$0xff]   ;;  %v1546_v25 = vld [vmem:[#allocation2 + $0x7c] ss:$12 sps:$4 sm:$0xff]   ;;  %v1566_v26 = vld [vmem:[#allocation2 + $0xf8] ss:$12 sps:$4 sm:$0xff]  }
  0x1a   :  { %1294 = vmatmul.mubr.msk.bf16.vlgmr.msra.gmra.mrb[0].mxu0 %vm70_vm1, %v41_v10  ;;  %v1541_v24 = vld [vmem:[#allocation2 + $0x60] ss:$12 sps:$4 sm:$0xff]   ;;  %v1567_v27 = vld [vmem:[#allocation2 + $0x38] ss:$12 sps:$4 sm:$0xff]   ;;  %v1571_v29 = vld [vmem:[#allocation2 + $0x110] ss:$12 sps:$4 sm:$0xff]  }
  0x1b   :  { %1296 = vmatmul.mubr.msk.bf16.vlgmr.msra.gmra.mrb[0].mxu1 %vm70_vm1, %v41_v10  ;;  %830 = vmatpush1.bf16.msra.mxu0 %v1529_v12  ;;  %v1544_v28 = vld [vmem:[#allocation2 + $0x78] ss:$12 sps:$4 sm:$0xff]   ;;  %v1572_v30 = vld [vmem:[#allocation2 + $0x50] ss:$12 sps:$4 sm:$0xff]   ;;  %v1549_v31 = vld [vmem:[#allocation2 + $0x94] ss:$12 sps:$4 sm:$0xff]  }
  0x1c   :  { %831 = vmatprep.subr.bf16.mxu0 %v1534_v13  ;;  %1418 = vmatpush3.bf16.msra.mxu1 %v1557_v19  ;;  %v1547_v32 = vld [vmem:[#allocation2 + $0x90] ss:$12 sps:$4 sm:$0xff]   ;;  %v1576_v33 = vld [vmem:[#allocation2 + $0x128] ss:$12 sps:$4 sm:$0xff]   ;;  %v1552_v35 = vld [vmem:[#allocation2 + $0xac] ss:$12 sps:$4 sm:$0xff]  }
  0x1d   :  { %1419 = vmatprep.subr.bf16.mxu1 %v1561_v22  ;;  %v1577_v34 = vld [vmem:[#allocation2 + $0x68] ss:$12 sps:$4 sm:$0xff]   ;;  %v1581_v37 = vld [vmem:[#allocation2 + $0x140] ss:$12 sps:$4 sm:$0xff]   ;;  %v1555_v38 = vld [vmem:[#allocation2 + $0xc4] ss:$12 sps:$4 sm:$0xff]  }
  0x1e   :  { %v1550_v36 = vld [vmem:[#allocation2 + $0xa8] ss:$12 sps:$4 sm:$0xff]   ;;  %v1582_v39 = vld [vmem:[#allocation2 + $0x80] ss:$12 sps:$4 sm:$0xff]   ;;  %v1558_v42 = vld [vmem:[#allocation2 + $0xd8] ss:$12 sps:$4 sm:$0xff]  }
  0x1f   :  { %832 = vmatpush1.bf16.msra.mxu0 %v1532_v14  ;;  %v1553_v40 = vld [vmem:[#allocation2 + $0xc0] ss:$12 sps:$4 sm:$0xff]   ;;  %v1560_v41 = vld [vmem:[#allocation2 + $0xdc] ss:$12 sps:$4 sm:$0xff]   ;;  %v1575_v47 = vld [vmem:[#allocation2 + $0x124] ss:$12 sps:$4 sm:$0xff]  }
  0x20   :  { %833 = vmatprep.subr.bf16.mxu0 %v1537_v15  ;;  %1420 = vmatpush3.bf16.msra.mxu1 %v1562_v23  ;;  %v1565_v43 = vld [vmem:[#allocation2 + $0xf4] ss:$12 sps:$4 sm:$0xff]   ;;  %v1563_v44 = vld [vmem:[#allocation2 + $0xf0] ss:$12 sps:$4 sm:$0xff]   ;;  %v1570_v45 = vld [vmem:[#allocation2 + $0x10c] ss:$12 sps:$4 sm:$0xff]  }
  0x21   :  { %1421 = vmatprep.subr.bf16.mxu1 %v1566_v26  ;;  %v1568_v46 = vld [vmem:[#allocation2 + $0x108] ss:$12 sps:$4 sm:$0xff]   ;;  %v1573_v48 = vld [vmem:[#allocation2 + $0x120] ss:$12 sps:$4 sm:$0xff]   ;;  %v1578_v50 = vld [vmem:[#allocation2 + $0x138] ss:$12 sps:$4 sm:$0xff]  }
  0x22   :  { %v1580_v49 = vld [vmem:[#allocation2 + $0x13c] ss:$12 sps:$4 sm:$0xff]   ;;  %v1585_v51 = vld [vmem:[#allocation2 + $0x154] ss:$12 sps:$4 sm:$0xff]   ;;  %v1586_v52 = vld [vmem:[#allocation2 + $0x158] ss:$12 sps:$4 sm:$0xff]  }
  0x23   :  { %834 = vmatpush1.bf16.msra.mxu0 %v1535_v16  ;;  %v1583_v53 = vld [vmem:[#allocation2 + $0x150] ss:$12 sps:$4 sm:$0xff]   ;;  %v1587_v54 = vld [vmem:[#allocation2 + $0x98] ss:$12 sps:$4 sm:$0xff]   ;;  %v1588_v57 = vld [vmem:[#allocation2 + $0x168] ss:$12 sps:$4 sm:$0xff]  }
  0x24   :  { %835 = vmatprep.subr.bf16.mxu0 %v1540_v17  ;;  %1422 = vmatpush3.bf16.msra.mxu1 %v1567_v27  ;;  %v1590_v55 = vld [vmem:[#allocation2 + $0x16c] ss:$12 sps:$4 sm:$0xff]   ;;  %v1591_v56 = vld [vmem:[#allocation2 + $0x170] ss:$12 sps:$4 sm:$0xff]   ;;  %v1596_v60 = vld [vmem:[#allocation2 + $0x248] ss:$12 sps:$4 sm:$0xff]  }
  0x25   :  { %1423 = vmatprep.subr.bf16.mxu1 %v1571_v29  ;;  %v1592_v58 = vld [vmem:[#allocation2 + $0xb0] ss:$12 sps:$4 sm:$0xff]   ;;  %v1792_v63 = vsub.s32 0, %v1789_v62  ;;  %v1802_v1 = vld [vmem:[%s1917_s4 + $0x8] sm:$0xff]  ;;  %v1598_v27 = vld [vmem:[#allocation2 + $0x198] ss:$12 sps:$4 sm:$0xff]  }
  0x26   :  { %v1595_v59 = vld [vmem:[#allocation2 + $0x184] ss:$12 sps:$4 sm:$0xff]   ;;  %v39_v2 = vld [vmem:[%s1917_s4 + $0x18] sm:$0xff]  ;;  %v1597_v22 = vld [vmem:[#allocation2 + $0x188] ss:$12 sps:$4 sm:$0xff]   ;;  %vm1734_vm2 = vmmov 0  }
  0x27   :  { %836 = vmatpush1.bf16.msra.mxu0 %v1538_v20  ;;  %v47_v3 = vrot.slane %v1797_v0, %v1792_v63  ;;  %v51_v4 = vrot.slane %v1802_v1, %v1792_v63  ;;  %v59_v5 = vrot.slane %v39_v2, %v1792_v63  ;;  %v1605_v29 = vld [vmem:[#allocation2 + $0x1b4] ss:$12 sps:$4 sm:$0xff]   ;;  %v1636_v61 = vld [vmem:[#allocation2 + $0x258] ss:$12 sps:$4 sm:$0xff]   ;;  %v1639_v2 = vld [vmem:[#allocation2 + $0x270] ss:$12 sps:$4 sm:$0xff]  }
  0x28   :  { %837 = vmatprep.subr.bf16.mxu0 %v1543_v21  ;;  %1424 = vmatpush3.bf16.msra.mxu1 %v1572_v30  ;;  %v1593_v21 = vld [vmem:[#allocation2 + $0x180] ss:$12 sps:$4 sm:$0xff]   ;;  %v1606_v30 = vld [vmem:[#allocation2 + $0x278] ss:$12 sps:$4 sm:$0xff]   ;;  %s1735_s11 = smov [#allocation5]  }
  0x29   :  { %1425 = vmatprep.subr.bf16.mxu1 %v1576_v33  ;;  %v1610_v33 = vld [vmem:[#allocation2 + $0x1cc] ss:$12 sps:$4 sm:$0xff]   ;;  %s1280_s12 = sshll.u32 %s1735_s11, 4  ;;  %s1281_s12 = int_to_ptr.vmem [resolvable:$true] %s1280_s12 }
  0x2a   :  { %p1708_p9 = scmp.lt.s32.totalorder %s1281_s12, %s1281_s12 }
  0x2b   :  { %838 = vmatpush1.bf16.msra.mxu0 %v1541_v24  ;;  %v1600_v24 = vld [vmem:[#allocation2 + $0x19c] ss:$12 sps:$4 sm:$0xff]  }
  0x2c   :  { %839 = vmatprep.subr.bf16.mxu0 %v1546_v25  ;;  %1426 = vmatpush3.bf16.msra.mxu1 %v1577_v34  ;;  %v1601_v25 = vld [vmem:[#allocation2 + $0x260] ss:$12 sps:$4 sm:$0xff]   ;;  %v1611_v34 = vld [vmem:[#allocation2 + $0x290] ss:$12 sps:$4 sm:$0xff]  }
  0x2d   :  { %1427 = vmatprep.subr.bf16.mxu1 %v1581_v37  ;;  %v1615_v37 = vld [vmem:[#allocation2 + $0x1e4] ss:$12 sps:$4 sm:$0xff]  }
  0x2f   :  { %840 = vmatpush1.bf16.msra.mxu0 %v1544_v28  ;;  %v1602_v28 = vld [vmem:[#allocation2 + $0x1a0] ss:$12 sps:$4 sm:$0xff]  }
  0x30   :  { %841 = vmatprep.subr.bf16.mxu0 %v1549_v31  ;;  %1428 = vmatpush3.bf16.msra.mxu1 %v1582_v39  ;;  %v1603_v31 = vld [vmem:[#allocation2 + $0x1b0] ss:$12 sps:$4 sm:$0xff]   ;;  %v1613_v39 = vld [vmem:[#allocation2 + $0x1e0] ss:$12 sps:$4 sm:$0xff]  }
  0x31   :  { %1429 = vmatprep.subr.bf16.mxu1 %v1586_v52  ;;  %v1630_v52 = vld [vmem:[#allocation2 + $0x22c] ss:$12 sps:$4 sm:$0xff]  }
  0x33   :  { %842 = vmatpush1.bf16.msra.mxu0 %v1547_v32  ;;  %v1607_v32 = vld [vmem:[#allocation2 + $0x1b8] ss:$12 sps:$4 sm:$0xff]  }
  0x34   :  { %843 = vmatprep.subr.bf16.mxu0 %v1552_v35  ;;  %1430 = vmatpush3.bf16.msra.mxu1 %v1587_v54  ;;  %v1608_v35 = vld [vmem:[#allocation2 + $0x1c8] ss:$12 sps:$4 sm:$0xff]  }
  0x35   :  { %1431 = vmatprep.subr.bf16.mxu1 %v1591_v56  ;;  %v1632_v56 = vld [vmem:[#allocation2 + $0x230] ss:$12 sps:$4 sm:$0xff]  }
  0x37   :  { %844 = vmatpush1.bf16.msra.mxu0 %v1550_v36  ;;  %v1612_v36 = vld [vmem:[#allocation2 + $0x1d0] ss:$12 sps:$4 sm:$0xff]  }
  0x38   :  { %845 = vmatprep.subr.bf16.mxu0 %v1555_v38  ;;  %1432 = vmatpush3.bf16.msra.mxu1 %v1592_v58  ;;  %v1616_v38 = vld [vmem:[#allocation2 + $0x2a8] ss:$12 sps:$4 sm:$0xff]  }
  0x39   :  { %1439 = vmatprep.subr.bf16.mxu1 %v1596_v60  ;;  %v1638_v60 = vld [vmem:[#allocation2 + $0x25c] ss:$12 sps:$4 sm:$0xff]  }
  0x3b   :  { %846 = vmatpush1.bf16.msra.mxu0 %v1553_v40  ;;  %v1617_v40 = vld [vmem:[#allocation2 + $0x1e8] ss:$12 sps:$4 sm:$0xff]  }
  0x3c   :  { %847 = vmatprep.subr.bf16.mxu0 %v1560_v41  ;;  %v1817_v41 = vld [vmem:[%s1917_s4 + $0x10] sm:$0xff] }
  0x3f   :  { %848 = vmatpush1.bf16.msra.mxu0 %v1558_v42  ;;  %v1620_v42 = vld [vmem:[#allocation2 + $0x1fc] ss:$12 sps:$4 sm:$0xff]  }
  0x40   :  { %849 = vmatprep.subr.bf16.mxu0 %v1565_v43  ;;  %v1621_v43 = vld [vmem:[#allocation2 + $0x2c0] ss:$12 sps:$4 sm:$0xff]  }
  0x43   :  { %850 = vmatpush1.bf16.msra.mxu0 %v1563_v44  ;;  %v55_v44 = vrot.slane %v1817_v41, %v1792_v63  ;;  %v1641_v63 = vld [vmem:[#allocation2 + $0x274] ss:$12 sps:$4 sm:$0xff]  }
  0x44   :  { %851 = vmatprep.subr.bf16.mxu0 %v1570_v45  ;;  %v1618_v45 = vld [vmem:[#allocation2 + $0x1f8] ss:$12 sps:$4 sm:$0xff]  }
  0x47   :  { %852 = vmatpush1.bf16.msra.mxu0 %v1568_v46  ;;  %v1622_v46 = vld [vmem:[#allocation2 + $0x200] ss:$12 sps:$4 sm:$0xff]  }
  0x48   :  { %853 = vmatprep.subr.bf16.mxu0 %v1575_v47  ;;  %v1625_v47 = vld [vmem:[#allocation2 + $0x214] ss:$12 sps:$4 sm:$0xff]  }
  0x4b   :  { %854 = vmatpush1.bf16.msra.mxu0 %v1573_v48  ;;  %v1626_v48 = vld [vmem:[#allocation2 + $0x2d8] ss:$12 sps:$4 sm:$0xff]  }
  0x4c   :  { %855 = vmatprep.subr.bf16.mxu0 %v1580_v49 }
  0x4f   :  { %856 = vmatpush1.bf16.msra.mxu0 %v1578_v50  ;;  %v1623_v50 = vld [vmem:[#allocation2 + $0x210] ss:$12 sps:$4 sm:$0xff]  }
  0x50   :  { %857 = vmatprep.subr.bf16.mxu0 %v1585_v51  ;;  %v1627_v51 = vld [vmem:[#allocation2 + $0x218] ss:$12 sps:$4 sm:$0xff]  }
  0x53   :  { %858 = vmatpush1.bf16.msra.mxu0 %v1583_v53  ;;  %v1631_v53 = vld [vmem:[#allocation2 + $0x2f0] ss:$12 sps:$4 sm:$0xff]  }
  0x54   :  { %859 = vmatprep.subr.bf16.mxu0 %v1590_v55  ;;  %v1628_v55 = vld [vmem:[#allocation2 + $0x228] ss:$12 sps:$4 sm:$0xff]  }
  0x57   :  { %860 = vmatpush1.bf16.msra.mxu0 %v1588_v57  ;;  %v1635_v57 = vld [vmem:[#allocation2 + $0x244] ss:$12 sps:$4 sm:$0xff]  }
  0x58   :  { %870 = vmatprep.subr.bf16.mxu0 %v1595_v59  ;;  %v1633_v59 = vld [vmem:[#allocation2 + $0x240] ss:$12 sps:$4 sm:$0xff]  }
  0xed   :  { %v121_v6 = vpop.f32.mrb[0].mxu0 }
  0xee   :  { %v122_v7 = vadd.f32 %v121_v6, %v47_v3  ;;  %v123_v8 = vpop.f32.mrb[1].mxu0  ;;  %v1812_v9 = vpop.f32.mrb[0].mxu1  ;;  %v1644_v3 = vld [vmem:[#allocation2 + $0x28c] ss:$12 sps:$4 sm:$0xff]  }
  0xef   :  { %v124_v10 = vadd.f32 %v123_v8, %v51_v4  ;;  %v125_v11 = vpop.f32.mrb[2].mxu0  ;;  %v164_v12 = vpop.f32.mrb[1].mxu1  ;;  %v163_v49 = vadd.f32 %v1812_v9, %v55_v44  ;;  %v1642_v4 = vld [vmem:[#allocation2 + $0x288] ss:$12 sps:$4 sm:$0xff]   ;;  %v1645_v6 = vld [vmem:[#allocation2 + $0x2a0] ss:$12 sps:$4 sm:$0xff]  }
  0xf0   :  { %v169_v13 = vmax.f32 %v122_v7, 0.0  ;;  %v126_v14 = vpop.f32.mrb[3].mxu0  ;;  %v165_v15 = vadd.f32 %v164_v12, %v59_v5  ;;  %v166_v16 = vpop.f32.mrb[2].mxu1  ;;  %v1647_v5 = vld [vmem:[#allocation2 + $0x2a4] ss:$12 sps:$4 sm:$0xff]  }
  0xf1   :  { %v170_v17 = vmax.f32 %v124_v10, 0.0  ;;  %v167_v18 = vpop.f32.mrb[3].mxu1  ;;  %v171_v54 = vmax.f32 %v163_v49, 0.0  ;;  %v1650_v7 = vld [vmem:[#allocation2 + $0x2bc] ss:$12 sps:$4 sm:$0xff]   ;;  %v1658_v14 = vld [vmem:[%s1916_s3] sm:$0xff]  }
  0xf2   :  { %v172_v19 = vmax.f32 %v165_v15, 0.0  ;;  %v173_v23 = vpack.c.bf16 %v169_v13, %v169_v13  ;;  %v1648_v8 = vld [vmem:[#allocation2 + $0x2b8] ss:$12 sps:$4 sm:$0xff]   ;;  %v1653_v9 = vld [vmem:[#allocation2 + $0x2d4] ss:$12 sps:$4 sm:$0xff]   ;;  %v1659_v15 = vld [vmem:[%s1916_s3 + $0x48] sm:$0xff]  }
  0xf3   :  { %v174_v20 = vpack.c.bf16 %v170_v17, %v170_v17  ;;  %v175_v58 = vpack.c.bf16 %v171_v54, %v171_v54  ;;  %v1651_v10 = vld [vmem:[#allocation2 + $0x2d0] ss:$12 sps:$4 sm:$0xff]   ;;  %v1656_v11 = vld [vmem:[#allocation2 + $0x2ec] ss:$12 sps:$4 sm:$0xff]   ;;  %v1654_v12 = vld [vmem:[#allocation2 + $0x2e8] ss:$12 sps:$4 sm:$0xff]  }
  0xf4   :  { %v176_v26 = vpack.c.bf16 %v172_v19, %v172_v19  ;;  %v1657_v13 = vld [vmem:[%s1916_s3 + $0x40] sm:$0xff]   ;;  %v1660_v16 = vld [vmem:[%s1916_s3 + $0x8] sm:$0xff]   ;;  %v1661_v17 = vld [vmem:[%s1916_s3 + $0x50] sm:$0xff]  }
  0xf5   :  { %861 = vmatprep.mubr.bf16.mxu0 %v174_v20  ;;  %943 = vmatprep.mubr.bf16.mxu1 %v174_v20  ;;  %v1662_v18 = vld [vmem:[%s1916_s3 + $0x10] sm:$0xff]   ;;  %v1663_v19 = vld [vmem:[%s1916_s3 + $0x58] sm:$0xff]  }
  0xf6   :  { %862 = vmatmul.mubr.bf16.vlgmr.msra.gmra.mrb[4].mxu0 %v173_v23  ;;  %944 = vmatmul.mubr.bf16.vlgmr.msra.gmra.mrb[4].mxu1 %v173_v23  ;;  %v1664_v20 = vld [vmem:[%s1916_s3 + $0x18] sm:$0xff]   ;;  %v1667_v23 = vld [vmem:[%s1916_s3 + $0x68] sm:$0xff]  }
  0xf7   :  { %871 = vmatpush1.bf16.msra.mxu0 %v1593_v21  ;;  %1440 = vmatpush3.bf16.msra.mxu1 %v1597_v22  ;;  %v1665_v21 = vld [vmem:[%s1916_s3 + $0x60] sm:$0xff]  }
  0xf8   :  { %872 = vmatprep.subr.bf16.mxu0 %v1600_v24  ;;  %1441 = vmatprep.subr.bf16.mxu1 %v1601_v25  ;;  %v1666_v22 = vld [vmem:[%s1916_s3 + $0x20] sm:$0xff]   ;;  %v1668_v24 = vld [vmem:[%s1916_s3 + $0x28] sm:$0xff]   ;;  %v1669_v25 = vld [vmem:[%s1916_s3 + $0x70] sm:$0xff]  }
  0xf9   :  { %983 = vmatprep.mubr.bf16.mxu1 %v176_v26  ;;  %902 = vmatprep.mubr.bf16.mxu0 %v176_v26  ;;  %v1670_v26 = vld [vmem:[%s1916_s3 + $0x30] sm:$0xff]  }
  0xfb   :  { %873 = vmatpush1.bf16.msra.mxu0 %v1598_v27  ;;  %1442 = vmatpush3.bf16.msra.mxu1 %v1602_v28  ;;  %v1671_v27 = vld [vmem:[%s1916_s3 + $0x78] sm:$0xff]  }
  0xfc   :  { %874 = vmatprep.subr.bf16.mxu0 %v1605_v29  ;;  %1443 = vmatprep.subr.bf16.mxu1 %v1606_v30  ;;  %v1672_v28 = vld [vmem:[%s1916_s3 + $0x38] sm:$0xff]   ;;  %v1733_v29 = vmov 0.0  }
  0xff   :  { %875 = vmatpush1.bf16.msra.mxu0 %v1603_v31  ;;  %1444 = vmatpush3.bf16.msra.mxu1 %v1607_v32 }
 0x100   :  { %876 = vmatprep.subr.bf16.mxu0 %v1610_v33  ;;  %1445 = vmatprep.subr.bf16.mxu1 %v1611_v34 }
 0x103   :  { %877 = vmatpush1.bf16.msra.mxu0 %v1608_v35  ;;  %1446 = vmatpush3.bf16.msra.mxu1 %v1612_v36  ;;  %v307_v35 = vsub.s32 1, %v1789_v62 }
 0x104   :  { %878 = vmatprep.subr.bf16.mxu0 %v1615_v37  ;;  %1447 = vmatprep.subr.bf16.mxu1 %v1616_v38 }
 0x105   :  { %v316_v36 = vrot.slane %v1817_v41, %v307_v35 }
 0x107   :  { %879 = vmatpush1.bf16.msra.mxu0 %v1613_v39  ;;  %1448 = vmatpush3.bf16.msra.mxu1 %v1617_v40 }
 0x108   :  { %880 = vmatprep.subr.bf16.mxu0 %v1620_v42  ;;  %1449 = vmatprep.subr.bf16.mxu1 %v1621_v43 }
 0x10b   :  { %881 = vmatpush1.bf16.msra.mxu0 %v1618_v45  ;;  %1450 = vmatpush3.bf16.msra.mxu1 %v1622_v46  ;;  %v308_v45 = vrot.slane %v1797_v0, %v307_v35  ;;  %v312_v46 = vrot.slane %v1802_v1, %v307_v35  ;;  %v1674_v1 = vld [vmem:[%s1916_s3 + $0x88] sm:$0xff]  }
 0x10c   :  { %882 = vmatprep.subr.bf16.mxu0 %v1625_v47  ;;  %1451 = vmatprep.subr.bf16.mxu1 %v1626_v48 }
 0x10f   :  { %883 = vmatpush1.bf16.msra.mxu0 %v1623_v50  ;;  %1452 = vmatpush3.bf16.msra.mxu1 %v1627_v51 }
 0x110   :  { %884 = vmatprep.subr.bf16.mxu0 %v1630_v52  ;;  %1453 = vmatprep.subr.bf16.mxu1 %v1631_v53 }
 0x113   :  { %885 = vmatpush1.bf16.msra.mxu0 %v1628_v55  ;;  %1454 = vmatpush3.bf16.msra.mxu1 %v1632_v56  ;;  %v1673_v55 = vld [vmem:[%s1916_s3 + $0x80] sm:$0xff]  }
 0x114   :  { %886 = vmatprep.subr.bf16.mxu0 %v1635_v57  ;;  %1461 = vmatprep.subr.bf16.mxu1 %v1657_v13  ;;  %v1675_v57 = vld [vmem:[%s1916_s3 + $0x90] sm:$0xff]  }
 0x116   :  { %984 = vmatmul.mubr.bf16.vlgmr.msra.gmra.mrb[8].mxu1 %v175_v58 }
 0x117   :  { %887 = vmatpush1.bf16.msra.mxu0 %v1633_v59  ;;  %1462 = vmatpush3.bf16.msra.mxu1 %v1658_v14  ;;  %v1677_v59 = vld [vmem:[%s1916_s3 + $0xa0] sm:$0xff]  }
 0x118   :  { %888 = vmatprep.subr.bf16.mxu0 %v1638_v60  ;;  %1463 = vmatprep.subr.bf16.mxu1 %v1659_v15  ;;  %v1678_v60 = vld [vmem:[%s1916_s3 + $0xa8] sm:$0xff]  }
 0x11b   :  { %889 = vmatpush1.bf16.msra.mxu0 %v1636_v61  ;;  %1464 = vmatpush3.bf16.msra.mxu1 %v1660_v16  ;;  %v1679_v61 = vld [vmem:[%s1916_s3 + $0xb0] sm:$0xff]  }
 0x11c   :  { %890 = vmatprep.subr.bf16.mxu0 %v1641_v63  ;;  %1465 = vmatprep.subr.bf16.mxu1 %v1661_v17  ;;  %v1680_v63 = vld [vmem:[%s1916_s3 + $0xb8] sm:$0xff]  }
 0x11f   :  { %891 = vmatpush1.bf16.msra.mxu0 %v1639_v2  ;;  %1466 = vmatpush3.bf16.msra.mxu1 %v1662_v18 }
 0x120   :  { %892 = vmatprep.subr.bf16.mxu0 %v1644_v3  ;;  %1467 = vmatprep.subr.bf16.mxu1 %v1663_v19 }
 0x123   :  { %893 = vmatpush1.bf16.msra.mxu0 %v1642_v4  ;;  %1468 = vmatpush3.bf16.msra.mxu1 %v1664_v20 }
 0x124   :  { %894 = vmatprep.subr.bf16.mxu0 %v1647_v5  ;;  %1469 = vmatprep.subr.bf16.mxu1 %v1665_v21 }
 0x127   :  { %895 = vmatpush1.bf16.msra.mxu0 %v1645_v6  ;;  %1470 = vmatpush3.bf16.msra.mxu1 %v1666_v22 }
 0x128   :  { %896 = vmatprep.subr.bf16.mxu0 %v1650_v7  ;;  %1471 = vmatprep.subr.bf16.mxu1 %v1667_v23 }
 0x12b   :  { %897 = vmatpush1.bf16.msra.mxu0 %v1648_v8  ;;  %1472 = vmatpush3.bf16.msra.mxu1 %v1668_v24 }
 0x12c   :  { %898 = vmatprep.subr.bf16.mxu0 %v1653_v9  ;;  %1473 = vmatprep.subr.bf16.mxu1 %v1669_v25  ;;  %v1047_v9 = vsub.s32 2, %v1789_v62 }
 0x12f   :  { %899 = vmatpush1.bf16.msra.mxu0 %v1651_v10  ;;  %1474 = vmatpush3.bf16.msra.mxu1 %v1670_v26  ;;  %v1048_v10 = vrot.slane %v1797_v0, %v1047_v9 }
 0x130   :  { %900 = vmatprep.subr.bf16.mxu0 %v1656_v11  ;;  %1475 = vmatprep.subr.bf16.mxu1 %v1671_v27 }
 0x133   :  { %901 = vmatpush1.bf16.msra.mxu0 %v1654_v12  ;;  %1476 = vmatpush3.bf16.msra.mxu1 %v1672_v28 }
 0x134   :  { %1492 = vmatprep.subr.bf16.mxu1 %v1733_v29 }
 0x136   :  { %903 = vmatmul.mubr.bf16.vlgmr.msra.gmra.mrb[4].mxu0 %v175_v58  ;;  %v1676_v58 = vld [vmem:[%s1916_s3 + $0x98] sm:$0xff]   ;;  %s1703_s3 = scalar_lea.vmem %s1281_s12, 128 }
 0x137   :  { %p1704_p8 = scmp.ne.s32.totalorder %s1281_s12, %s1703_s3  ;;  %p1709_p10 = scmp.lt.s32.totalorder %s1703_s3, %s1703_s3 }
 0x139   :  { %p1710_p11 = por %p1709_p10, %p1708_p9 }
 0x13b   :  { %p1711_p12 = pnand %p1710_p11, %p1704_p8 }
 0x1c9   :  { %v1433_v30 = vpop.f32.mrb[4].mxu1 }
 0x1ca   :  { %v1434_v31 = vpop.f32.mrb[5].mxu1 }
 0x1cb   :  { %v1435_v32 = vadd.f32 %v1434_v31, %v1433_v30  ;;  %v1436_v33 = vpop.f32.mrb[6].mxu1 }
 0x1cc   :  { %v1437_v34 = vpop.f32.mrb[7].mxu1 }
 0x1cd   :  { %v946_v39 = vadd.f32 %v1435_v32, %v316_v36 }
 0x1e9   :  { %v1455_v37 = vpop.f32.mrb[8].mxu1 }
 0x1ea   :  { %v1456_v38 = vpop.f32.mrb[9].mxu1 }
 0x1eb   :  { %v1457_v40 = vadd.f32 %v1456_v38, %v1455_v37  ;;  %v1458_v42 = vpop.f32.mrb[10].mxu1 }
 0x1ec   :  { %v1459_v43 = vpop.f32.mrb[11].mxu1 }
 0x1ed   :  { %v986_v44 = vadd.f32 %v1457_v40, %v946_v39 }
 0x1ef   :  { %v993_v2 = vmax.f32 %v986_v44, 0.0 }
 0x1f1   :  { %v996_v3 = vpack.c.bf16 %v993_v2, %v993_v2 }
 0x209   :  { %v904_v47 = vpop.f32.mrb[4].mxu0 }
 0x20a   :  { %v1512_v48 = vadd.f32 %v904_v47, %v308_v45  ;;  %v906_v49 = vpop.f32.mrb[5].mxu0 }
 0x20b   :  { %v1513_v50 = vadd.f32 %v906_v49, %v312_v46  ;;  %v908_v51 = vpop.f32.mrb[6].mxu0 }
 0x20c   :  { %v991_v52 = vmax.f32 %v1512_v48, 0.0  ;;  %v909_v53 = vpop.f32.mrb[7].mxu0 }
 0x20d   :  { %v992_v54 = vmax.f32 %v1513_v50, 0.0 }
 0x20e   :  { %v994_v56 = vpack.c.bf16 %v991_v52, %v991_v52 }
 0x20f   :  { %v995_v41 = vpack.c.bf16 %v992_v54, %v992_v54 }
 0x211   :  { %1225 = vmatprep.mubr.bf16.mxu1 %v995_v41 }
 0x212   :  { %1226 = vmatmul.mubr.bf16.vlgmr.msra.gmra.mrb[12].mxu1 %v994_v56 }
 0x213   :  { %1493 = vmatpush3.bf16.msra.mxu1 %v1673_v55  ;;  %1508 = vmatprep.mubr.msk.bf16.mxu1 %vm1734_vm2, %v1733_v29 }
 0x214   :  { %1494 = vmatprep.subr.bf16.mxu1 %v1733_v29 }
 0x217   :  { %1495 = vmatpush3.bf16.msra.mxu1 %v1674_v1 }
 0x218   :  { %1496 = vmatprep.subr.bf16.mxu1 %v1733_v29 }
 0x21b   :  { %1497 = vmatpush3.bf16.msra.mxu1 %v1675_v57 }
 0x21c   :  { %1498 = vmatprep.subr.bf16.mxu1 %v1733_v29 }
 0x21f   :  { %1499 = vmatpush3.bf16.msra.mxu1 %v1676_v58 }
 0x220   :  { %1500 = vmatprep.subr.bf16.mxu1 %v1733_v29 }
 0x223   :  { %1501 = vmatpush3.bf16.msra.mxu1 %v1677_v59 }
 0x224   :  { %1502 = vmatprep.subr.bf16.mxu1 %v1733_v29 }
 0x227   :  { %1503 = vmatpush3.bf16.msra.mxu1 %v1678_v60 }
 0x228   :  { %1504 = vmatprep.subr.bf16.mxu1 %v1733_v29 }
 0x22b   :  { %1505 = vmatpush3.bf16.msra.mxu1 %v1679_v61 }
 0x22c   :  { %1506 = vmatprep.subr.bf16.mxu1 %v1733_v29 }
 0x22f   :  { %1507 = vmatpush3.bf16.msra.mxu1 %v1680_v63 }
 0x232   :  { %1509 = vmatmul.mubr.bf16.vlgmr.msra.gmra.mrb[16].mxu1 %v996_v3 }
 0x2e5   :  { %v1477_v4 = vpop.f32.mrb[12].mxu1 }
 0x2e6   :  { %v1478_v5 = vpop.f32.mrb[13].mxu1 }
 0x2e7   :  { %v1479_v6 = vadd.f32 %v1478_v5, %v1477_v4  ;;  %v1480_v7 = vpop.f32.mrb[14].mxu1 }
 0x2e8   :  { %v1481_v8 = vpop.f32.mrb[15].mxu1 }
 0x2e9   :  { %v1228_v11 = vadd.f32 %v1479_v6, %v1048_v10 }
 0x305   :  { %v1267_v12 = vpop.f32.mrb[16].mxu1 }
 0x306   :  { %v1268_v13 = vadd.f32 %v1267_v12, %v1228_v11  ;;  %v1510_v14 = vpop.f32.mrb[17].mxu1 }
 0x307   :  { %v1270_v15 = vpop.f32.mrb[18].mxu1 }
 0x308   :  { %1273 = vst.msk [vmem:[#allocation5] sm:$0xff] %vm70_vm1, %v1268_v13  ;;  %v1511_v16 = vpop.f32.mrb[19].mxu1 }
 0x309   :  { %1714 = shalt.err (!%p1711_p12)
}
 0x30a   :  { %s1715_s2 = scalar_lea.hbm %s1918_s5, 128 }
 0x30b   :  { %p1716_p13 = scmp.ne.s32.totalorder %s1918_s5, %s1715_s2  ;;  %p1719_p0 = scmp.lt.u32.totalorder %s1715_s2, %s1918_s5 }
 0x30d   :  { %p1721_p1 = pnand %p1719_p0, %p1716_p13 }
 0x30f   :  { %1724 = shalt.err (!%p1721_p1)
}
 0x310   :  { %1283 = dma.vmem_to_hbm [thread:$0]  %s1281_s12, 128, %s1918_s5, [#allocation4]  }
 0x311   :  { %1727 = dma.done.wait [#allocation4], 128  }
 0x312   :  { %1728 = vsyncadd [#allocation4], 4294967168 }
 0x313   :  { %1287 = vsyncpa [#allocation3], 1 }
 0x314   :  { %1288 = vsyncpa [#allocation4], 1 }

</bundles_post_ra>
